<compile_context>
chip_gen: v7x
topology: tpu7x:2x2x1
jax: 0.10.0
libtpu: 0.0.40
codegen_flags: <defaults>
</compile_context>

<pallas_src>
import functools
import math

import jax
import jax.numpy as jnp
import numpy as np
from jax.experimental import pallas as pl
from jax.experimental.pallas import tpu as pltpu


# ---------------------------------------------------------------------------
# Kernel 1: prompt weights = softmax(Linear(mean_{H,W}(x)))
# ---------------------------------------------------------------------------
def _prompt_weights_kernel(x_ref, wlt_ref, b_ref, o_ref):
    # x_ref: (1, C, H*W)   wlt_ref: (C, L)   b_ref: (1, L)   o_ref: (1, 1, L)
    x = x_ref[...].astype(jnp.float32)                       # (1, C, HW)
    emb = jnp.mean(x, axis=2)                                # (1, C)  lane reduce
    logits = jnp.dot(emb, wlt_ref[...].astype(jnp.float32),
                     preferred_element_type=jnp.float32)     # (1, L)  MXU
    logits = logits + b_ref[...].astype(jnp.float32)
    m = jnp.max(logits, axis=-1, keepdims=True)
    e = jnp.exp(logits - m)
    soft = e / jnp.sum(e, axis=-1, keepdims=True)
    o_ref[...] = soft[None].astype(o_ref.dtype)              # (1, 1, L)


# ---------------------------------------------------------------------------
# Kernel 2: weighted sum over prompt_len + bilinear resize as ONE lane-dense
# MXU matmul:
#   wsum[c, p*Ps+q] = sum_l w[l] * P[l, c, p*Ps+q]            (L small -> VPU fmas)
#   out[c, h*W+w]   = sum_{p,q} wsum[c, p*Ps+q] * MT[p*Ps+q, h*W+w]
# where MT = kron(A_h, A_w)^T is a trace-time constant interpolation matrix.
# ---------------------------------------------------------------------------
def _prompt_resize_kernel(w_ref, p_ref, mt_ref, o_ref):
    # w_ref: (1, 1, L)  p_ref: (L, tc, S)  mt_ref: (S, H*W)  o_ref: (1, tc, H*W)
    L = p_ref.shape[0]
    wv = w_ref[...].astype(jnp.float32)                      # (1, 1, L)
    wsum = wv[0, :, 0:1] * p_ref[0].astype(jnp.float32)      # (tc, S)
    for l in range(1, L):
        wsum = wsum + wv[0, :, l:l + 1] * p_ref[l].astype(jnp.float32)
    res = jnp.dot(wsum, mt_ref[...].astype(jnp.float32),
                  preferred_element_type=jnp.float32)        # (tc, HW)  MXU
    o_ref[...] = res[None].astype(o_ref.dtype)


# ---------------------------------------------------------------------------
# Kernel 3: 3x3 conv, padding=1, no bias, on lane-dense (C, H*W) tiles.
# Neighbor shift along the flattened spatial axis is a static lane concat-roll;
# row/column boundary contributions are zeroed with an iota mask (same effect
# as zero padding).
# ---------------------------------------------------------------------------
def _conv3x3_kernel(x_ref, w_ref, o_ref, *, H, W):
    # x_ref: (1, Cin, H*W)  w_ref: (9, Cout, Cin)  o_ref: (1, Cout, H*W)
    HW = H * W
    x = x_ref[0].astype(jnp.float32)                         # (Cin, HW)
    pos = jax.lax.broadcasted_iota(jnp.int32, (1, HW), 1)
    row = pos // W
    col = pos % W
    acc = None
    k = 0
    for dy in (-1, 0, 1):
        for dx in (-1, 0, 1):
            off = dy * W + dx
            if off == 0:
                shifted = x
            else:
                s = off % HW                                  # positive static shift
                shifted = jnp.concatenate([x[:, s:], x[:, :s]], axis=1)
            valid = ((row + dy >= 0) & (row + dy < H) &
                     (col + dx >= 0) & (col + dx < W))
            xm = jnp.where(valid, shifted, 0.0)
            term = jnp.dot(w_ref[k].astype(jnp.float32), xm,
                           preferred_element_type=jnp.float32)
            acc = term if acc is None else acc + term
            k += 1
    o_ref[...] = acc[None].astype(o_ref.dtype)


# ---------------------------------------------------------------------------
# Host-side helpers (trace-time constants)
# ---------------------------------------------------------------------------
def _bilinear_matrix(out_size, in_size):
    """Matrix A (out, in) reproducing F.interpolate(mode='bilinear',
    align_corners=False) along one axis: out = A @ in."""
    A = np.zeros((out_size, in_size), dtype=np.float32)
    if in_size == 1:
        A[:, 0] = 1.0
        return A
    scale = in_size / out_size
    for i in range(out_size):
        src = max((i + 0.5) * scale - 0.5, 0.0)
        i0 = min(int(np.floor(src)), in_size - 1)
        i1 = min(i0 + 1, in_size - 1)
        lam = src - i0
        A[i, i0] += 1.0 - lam
        A[i, i1] += lam
    return A


def _pick_channel_tile(pd, L, S, HW, budget_bytes=8 * 1024 * 1024):
    """Largest channel tile tc (tc == pd or a multiple of 8, divides pd) whose
    double-buffered K2 block footprint fits the VMEM budget."""
    def fits(tc):
        b = 4 * (2 * L * tc * S + 2 * tc * HW + 2 * S * HW + tc * S)
        return b <= budget_bytes
    for tc in range(pd, 0, -1):
        if pd % tc != 0:
            continue
        if tc != pd and tc % 8 != 0:
            continue
        if fits(tc):
            return tc
    return pd if pd < 8 else 8


def prompt_gen_block(x, prompt_param, lin_w, lin_b, conv_w):
    """x: (B, lin_dim, H, W); prompt_param: (1, L, Pd, Ps, Ps);
    lin_w: (L, lin_dim); lin_b: (L,); conv_w: (Pd, Pd, 3, 3) -> (B, Pd, H, W)."""
    B, C, H, W = x.shape
    _, L, Pd, Ps, _ = prompt_param.shape
    HW = H * W
    S = Ps * Ps

    # ---- Kernel 1: prompt weights -----------------------------------------
    x3 = x.reshape(B, C, HW)                    # free contiguous view
    wlt = jnp.transpose(lin_w, (1, 0))          # (C, L)  tiny parameter transpose
    b2 = lin_b.reshape(1, L)
    weights = pl.pallas_call(
        _prompt_weights_kernel,
        out_shape=jax.ShapeDtypeStruct((B, 1, L), jnp.float32),
        grid_spec=pltpu.PrefetchScalarGridSpec(
            num_scalar_prefetch=0,
            grid=(B,),
            in_specs=[
                pl.BlockSpec((1, C, HW), lambda b: (b, 0, 0)),
                pl.BlockSpec((C, L), lambda b: (0, 0)),
                pl.BlockSpec((1, L), lambda b: (0, 0)),
            ],
            out_specs=pl.BlockSpec((1, 1, L), lambda b: (b, 0, 0)),
        ),
        compiler_params=pltpu.CompilerParams(dimension_semantics=("parallel",)),
    )(x3, wlt, b2)

    # ---- Kernel 2: weighted prompt sum + bilinear resize --------------------
    pflat = prompt_param.reshape(L, Pd, S)              # free contiguous view
    a_h = _bilinear_matrix(H, Ps)                       # (H, Ps)
    a_w = _bilinear_matrix(W, Ps)                       # (W, Ps)
    # TODO(synk): for very large Ps/H/W the dense kron matrix exceeds VMEM; a
    # separable two-pass resize tiled over H*W would be needed in that regime.
    mt = jnp.asarray(np.kron(a_h, a_w).T)               # (S, HW) trace-time const
    tc = _pick_channel_tile(Pd, L, S, HW)
    resized = pl.pallas_call(
        _prompt_resize_kernel,
        out_shape=jax.ShapeDtypeStruct((B, Pd, HW), jnp.float32),
        grid_spec=pltpu.PrefetchScalarGridSpec(
            num_scalar_prefetch=0,
            grid=(B, Pd // tc),
            in_specs=[
                pl.BlockSpec((1, 1, L), lambda b, c: (b, 0, 0)),
                pl.BlockSpec((L, tc, S), lambda b, c: (0, c, 0)),
                pl.BlockSpec((S, HW), lambda b, c: (0, 0)),
            ],
            out_specs=pl.BlockSpec((1, tc, HW), lambda b, c: (b, c, 0)),
        ),
        compiler_params=pltpu.CompilerParams(
            dimension_semantics=("parallel", "parallel")),
    )(weights, pflat, mt)

    # ---- Kernel 3: 3x3 conv (padding=1, no bias) ----------------------------
    wt9 = jnp.transpose(conv_w, (2, 3, 0, 1)).reshape(9, Pd, Pd)
    out = pl.pallas_call(
        functools.partial(_conv3x3_kernel, H=H, W=W),
        out_shape=jax.ShapeDtypeStruct((B, Pd, HW), jnp.float32),
        grid_spec=pltpu.PrefetchScalarGridSpec(
            num_scalar_prefetch=0,
            grid=(B,),
            in_specs=[
                pl.BlockSpec((1, Pd, HW), lambda b: (b, 0, 0)),
                pl.BlockSpec((9, Pd, Pd), lambda b: (0, 0, 0)),
            ],
            out_specs=pl.BlockSpec((1, Pd, HW), lambda b: (b, 0, 0)),
        ),
        compiler_params=pltpu.CompilerParams(dimension_semantics=("parallel",)),
    )(resized, wt9)
    return out.reshape(B, Pd, H, W)


# ---------------------------------------------------------------------------
# Pure-JAX reference matching the PyTorch module
# ---------------------------------------------------------------------------
def _ref_bilinear(xx, out_h, out_w):
    # F.interpolate(mode='bilinear', align_corners=False), no antialias.
    _, _, ih, iw = xx.shape

    def axis(out_size, in_size):
        src = np.maximum((np.arange(out_size) + 0.5) * (in_size / out_size) - 0.5, 0.0)
        i0 = np.minimum(np.floor(src).astype(np.int64), in_size - 1)
        i1 = np.minimum(i0 + 1, in_size - 1)
        lam = (src - i0).astype(np.float32)
        return i0, i1, lam

    h0, h1, lh = axis(out_h, ih)
    w0, w1, lw = axis(out_w, iw)
    xh = (xx[:, :, h0, :] * (1.0 - lh)[None, None, :, None]
          + xx[:, :, h1, :] * lh[None, None, :, None])
    return (xh[:, :, :, w0] * (1.0 - lw)[None, None, None, :]
            + xh[:, :, :, w1] * lw[None, None, None, :])


def _reference(x, prompt_param, lin_w, lin_b, conv_w):
    B, C, H, W = x.shape
    emb = jnp.mean(x, axis=(2, 3))
    logits = emb @ lin_w.T + lin_b
    pw = jax.nn.softmax(logits, axis=1)
    prompt = jnp.einsum('bl,lcpq->bcpq', pw, prompt_param[0])
    prompt = _ref_bilinear(prompt, H, W)
    return jax.lax.conv_general_dilated(
        prompt, conv_w, window_strides=(1, 1), padding='SAME',
        dimension_numbers=('NCHW', 'OIHW', 'NCHW'))


if __name__ == "__main__":
    key = jax.random.PRNGKey(0)
    B, lin_dim, H, W = 2, 32, 16, 16
    prompt_len, prompt_dim, prompt_size = 5, 16, 8

    k1, k2, k3, k4, k5 = jax.random.split(key, 5)
    x = jax.random.normal(k1, (B, lin_dim, H, W), dtype=jnp.float32)
    prompt_param = jax.random.uniform(
        k2, (1, prompt_len, prompt_dim, prompt_size, prompt_size), dtype=jnp.float32)
    lim = 1.0 / math.sqrt(lin_dim)
    lin_w = jax.random.uniform(k3, (prompt_len, lin_dim),
                               minval=-lim, maxval=lim, dtype=jnp.float32)
    lin_b = jax.random.uniform(k4, (prompt_len,),
                               minval=-lim, maxval=lim, dtype=jnp.float32)
    clim = 1.0 / math.sqrt(prompt_dim * 9)
    conv_w = jax.random.uniform(k5, (prompt_dim, prompt_dim, 3, 3),
                                minval=-clim, maxval=clim, dtype=jnp.float32)

    out = jax.block_until_ready(prompt_gen_block(x, prompt_param, lin_w, lin_b, conv_w))
    ref = jax.block_until_ready(_reference(x, prompt_param, lin_w, lin_b, conv_w))

    if bool(jnp.allclose(out, ref, atol=1e-4, rtol=1e-4)):
        print("KERNEL_OK")
    else:
        print("MISMATCH", float(jnp.max(jnp.abs(out - ref))))
</pallas_src>

<mosaic_0001>
module attributes {stable_mosaic.version = 11 : i64} {
  func.func @_prompt_weights_kernel(%arg0: i32, %arg1: memref<1x32x256xf32, #tpu.memory_space<vmem>>, %arg2: memref<32x5xf32, #tpu.memory_space<vmem>>, %arg3: memref<1x5xf32, #tpu.memory_space<vmem>>, %arg4: memref<1x1x5xf32, #tpu.memory_space<vmem>>) attributes {dimension_semantics = [#tpu.dimension_semantics<parallel>], iteration_bounds = array<i64: 2>, scalar_prefetch = 0 : i64, scratch_operands = 0 : i64, tpu.core_type = #tpu.core_type<tc>, window_params = [{transform_indices = @transform_0, window_bounds = array<i64: 1, 32, 256>}, {pipeline_mode = #tpu.pipeline_mode<synchronous>, transform_indices = @transform_1, window_bounds = array<i64: 32, 5>}, {pipeline_mode = #tpu.pipeline_mode<synchronous>, transform_indices = @transform_2, window_bounds = array<i64: 1, 5>}, {transform_indices = @transform_3, window_bounds = array<i64: 1, 1, 5>}]} {
    %c0 = arith.constant 0 : index
    %c0_0 = arith.constant 0 : index
    %c0_1 = arith.constant 0 : index
    %0 = vector.load %arg1[%c0, %c0_0, %c0_1] : memref<1x32x256xf32, #tpu.memory_space<vmem>>, vector<1x32x256xf32>
    %cst = arith.constant dense<0.000000e+00> : vector<1x32xf32>
    %1 = vector.multi_reduction <add>, %0, %cst [2] : vector<1x32x256xf32> to vector<1x32xf32>
    %cst_2 = arith.constant 2.560000e+02 : f32
    %2 = vector.broadcast %cst_2 : f32 to vector<1x32xf32>
    %3 = arith.divf %1, %2 : vector<1x32xf32>
    %c0_3 = arith.constant 0 : index
    %c0_4 = arith.constant 0 : index
    %4 = vector.load %arg2[%c0_3, %c0_4] : memref<32x5xf32, #tpu.memory_space<vmem>>, vector<32x5xf32>
    %cst_5 = arith.constant dense<0.000000e+00> : vector<1x5xf32>
    %5 = tpu.matmul %3, %4, %cst_5 {dimension_numbers = #tpu.dot_dimension_numbers<[1], [0], [0], [1], [0, 0, 1, 1], [], []>} : vector<1x32xf32>, vector<32x5xf32>, vector<1x5xf32> -> vector<1x5xf32>
    %c0_6 = arith.constant 0 : index
    %c0_7 = arith.constant 0 : index
    %6 = vector.load %arg3[%c0_6, %c0_7] : memref<1x5xf32, #tpu.memory_space<vmem>>, vector<1x5xf32>
    %7 = arith.addf %5, %6 : vector<1x5xf32>
    %cst_8 = arith.constant dense<0xFF800000> : vector<1xf32>
    %8 = vector.multi_reduction <maximumf>, %7, %cst_8 [1] : vector<1x5xf32> to vector<1xf32>
    %9 = vector.shape_cast %8 : vector<1xf32> to vector<1x1xf32>
    %10 = vector.broadcast %9 : vector<1x1xf32> to vector<1x5xf32>
    %11 = arith.subf %7, %10 : vector<1x5xf32>
    %12 = math.exp %11 : vector<1x5xf32>
    %cst_9 = arith.constant dense<0.000000e+00> : vector<1xf32>
    %13 = vector.multi_reduction <add>, %12, %cst_9 [1] : vector<1x5xf32> to vector<1xf32>
    %14 = vector.shape_cast %13 : vector<1xf32> to vector<1x1xf32>
    %15 = vector.broadcast %14 : vector<1x1xf32> to vector<1x5xf32>
    %16 = arith.divf %12, %15 : vector<1x5xf32>
    %17 = vector.shape_cast %16 : vector<1x5xf32> to vector<1x1x5xf32>
    %c0_10 = arith.constant 0 : index
    %c0_11 = arith.constant 0 : index
    %c0_12 = arith.constant 0 : index
    %18 = vector.load %arg4[%c0_10, %c0_11, %c0_12] : memref<1x1x5xf32, #tpu.memory_space<vmem>>, vector<1x1x5xf32>
    tpu.vector_store %arg4[%c0_10, %c0_11, %c0_12], %17 {strides = array<i32>} : memref<1x1x5xf32, #tpu.memory_space<vmem>>, vector<1x1x5xf32>,
    return
  }
  func.func @transform_0(%arg0: i32) -> (i32, i32, i32) {
    %c0_i32 = arith.constant 0 : i32
    %c0_i32_0 = arith.constant 0 : i32
    %c0_i32_1 = arith.constant 0 : i32
    return %arg0, %c0_i32, %c0_i32_0 : i32, i32, i32
  }
  func.func @transform_1(%arg0: i32) -> (i32, i32) {
    %c0_i32 = arith.constant 0 : i32
    %c0_i32_0 = arith.constant 0 : i32
    %c0_i32_1 = arith.constant 0 : i32
    return %c0_i32, %c0_i32_0 : i32, i32
  }
  func.func @transform_2(%arg0: i32) -> (i32, i32) {
    %c0_i32 = arith.constant 0 : i32
    %c0_i32_0 = arith.constant 0 : i32
    %c0_i32_1 = arith.constant 0 : i32
    return %c0_i32, %c0_i32_0 : i32, i32
  }
  func.func @transform_3(%arg0: i32) -> (i32, i32, i32) {
    %c0_i32 = arith.constant 0 : i32
    %c0_i32_0 = arith.constant 0 : i32
    %c0_i32_1 = arith.constant 0 : i32
    return %arg0, %c0_i32, %c0_i32_0 : i32, i32, i32
  }
}

</mosaic_0001>

<bundles_post_ra>
// kernel: tpu_custom_call.1
= control target key start
LH: loop header
LB: loop body
LE: loop exit
PB: predicated region body
PF: predicated region fallthrough
CT: control target
= control target key end

     0   :  { %8 = vsyncpa [#allocation3], 0  ;;  %s808_s0 = inlined_call_operand.hbm [shape: f32[2,32,256], index: 0, kind: input, shape index: {}]   ;;  %s809_s1 = inlined_call_operand.vmem [shape: f32[32,5], index: 1, kind: input, shape index: {}]   ;;  %s810_s2 = inlined_call_operand.vmem [shape: f32[1,5], index: 2, kind: input, shape index: {}]   ;;  %s811_s3 = inlined_call_operand.hbm [shape: f32[2,1,5], index: 3, kind: output, shape index: {}]  }
   0x1   :  { %10 = vsyncpa [#allocation3 + $0x1], 0 }
   0x2   :  { %11 = vsyncpa [#allocation4], 0 }
   0x3   :  { %13 = vsyncpa [#allocation4 + $0x1], 0  ;;  %s629_s12 = smov 0   ;;  %s631_s13 = smov 0  }
   0x4   :  { %s633_s14 = smov 0   ;;  %s635_s15 = smov 0  }
   0x5 LB: > { %s650_s16 = sadd.s32 4294967295, %s600_s15   ;;  %s414_s17 = sadd.s32 4294967294, %s600_s15   ;;  %s600_s15 = sphi %s635_s15, %s824_s15   ;;  %s596_s14 = sphi %s633_s14, %s823_s14   ;;  %s592_s13 = sphi %s631_s13, %s822_s13   ;;  %s588_s12 = sphi %s629_s12, %s821_s12  }
   0x6   : > { %s654_s18 = sadd.s32 1, %s600_s15   ;;  %s26_s19 = sadd.s32 1, %s596_s14 }
   0x7   : > { %s23_s20 = ssub.s32 %s600_s15, %s654_s18  ;;  %p33_p0 = scmp.ne.s32.totalorder %s596_s14, %s592_s13 }
   0x8   : > { %p24_p1 = scmp.eq.s32.totalorder %s23_s20, 0  ;;  %p34_p2 = scmp.eq.s32.totalorder %s600_s15, 0 }
   0x9   : > { %p39_p3 = scmp.ne.s32.totalorder %s592_s13, %s588_s12  ;;  %p40_p4 = scmp.eq.s32.totalorder %s650_s16, 0 }
   0xa   : > { %s666_s21 = scalar_select %p24_p1, %s596_s14, %s26_s19  }
   0xb   : > { %p668_p5 = por %p34_p2, %p33_p0  ;;  %p672_p6 = por %p40_p4, %p39_p3 }
   0xc   : > { %p105_p7 = scmp.eq.s32.totalorder %s650_s16, 1  ;;  %p111_p8 = scmp.eq.s32.totalorder %s414_s17, 1 }
   0xd   : > { %p461_p10 = scmp.lt.s32.totalorder %s600_s15, 2  ;;  %s137_s26 = sand.u32 1, %s596_s14  }
   0xe   : > { %p679_p11 = por %p105_p7, %p33_p0  ;;  %p683_p12 = por %p111_p8, %p39_p3 }
   0xf   : > { %s426_s27 = sshll.u32 %s600_s15, 10  ;;  %s417_s28 = sshll.u32 %s137_s26, 6 }
  0x10   : > { %s815_s24 = scalar_select %p679_p11, 1, 0 }
  0x11   : > { %s816_s25 = scalar_select %p683_p12, 1, 0 }
  0x12   : > { %s692_s4 = scalar_lea.hbm %s808_s0, %s426_s27  ;;  %s141_s5 = scalar_lea.vmem [#allocation2], %s417_s28 }
  0x13   : > { %s148_s6 = sshll.u32 %s141_s5, 4  ;;  %p696_p13 = pnand %p461_p10, %p668_p5  ;;  %s700_s6 = int_to_ptr.vmem [resolvable:$true] %s148_s6 }
  0x14   : > { %s702_s8 = scalar_lea.sflag [#allocation3], %s137_s26  ;;  %s504_s9 = scalar_lea.hbm %s692_s4, 1024 }
  0x15   : > { %p505_p0 = scmp.ne.s32.totalorder %s692_s4, %s504_s9  ;;  %p506_p1 = pneg %p696_p13 }
  0x16   : > { %s509_s17 = scalar_lea.hbm %s808_s0, 2048  ;;  %p510_p4 = scmp.lt.u32.totalorder %s692_s4, %s808_s0 }
  0x17   : > { %p507_p2 = pnand %p506_p1, %p505_p0  ;;  %p511_p5 = scmp.lt.u32.totalorder %s509_s17, %s504_s9 }
  0x18   : > { %p513_p8 = scmp.lt.u32.totalorder %s504_s9, %s692_s4 }
  0x19   : > { %p508_p3 = pneg %p507_p2  ;;  %p512_p7 = por %p511_p5, %p510_p4 }
  0x1b   : > { %p514_p10 = por %p513_p8, %p512_p7 }
  0x1d   : > { %p515_p9 = pnand %p514_p10, %p508_p3 }
  0x1f   : > { %518 = shalt.err (!%p515_p9)
}
  0x20   : > { %s519_s22 = scalar_lea.vmem %s700_s6, 1024  ;;  %s602_s26 = smov [#allocation2]  }
  0x21   : > { %p520_p0 = scmp.ne.s32.totalorder %s700_s6, %s519_s22  ;;  %s524_s27 = sshll.u32 %s602_s26, 4  ;;  %s525_s27 = int_to_ptr.vmem [resolvable:$false] %s524_s27 }
  0x22   : > { %s526_s28 = scalar_lea.vmem %s525_s27, 2048  ;;  %p527_p11 = scmp.lt.s32.totalorder %s700_s6, %s525_s27 }
  0x23   : > { %p522_p2 = pnand %p520_p0, %p506_p1  ;;  %p528_p4 = scmp.lt.s32.totalorder %s526_s28, %s519_s22 }
  0x25   : > { %p523_p12 = pneg %p522_p2  ;;  %p529_p5 = por %p528_p4, %p527_p11 }
  0x27   : > { %p530_p7 = pnand %p529_p5, %p523_p12 }
  0x29   : > { %533 = shalt.err (!%p530_p7)
}
  0x2a   : > { %s603_s29 = smov 256   ;;  %s604_s30 = smov 16  }
  0x2b   : > { %456 = dma.hbm_to_vmem [thread:$0]  (!%p696_p13), %s692_s4, 1024, %s700_s6, %s702_s8, %s603_s29, %s603_s29, %s604_s30  }
  0x2c   : > { %p420_p9 = scmp.ge.s32.totalorder %s600_s15, 1  ;;  %p156_p1 = scmp.lt.s32.totalorder %s600_s15, 3 }
  0x2e   : > { %p157_p3 = pnand %p420_p9, %p156_p1 }
  0x2f   : > { %s733_s5 = sand.u32 (!%p157_p3), 1, %s592_s13  }
  0x30   : > { %160 = sbr.rel (%p157_p3) target bundleno = 754 (0x2f2), region = 32  ;;  %s421_s9 = sshll.u32 (!%p157_p3), %s733_s5, 6 }
  0x31   : > { %s163_s10 = scalar_lea.sflag (!%p157_p3), [#allocation3], %s733_s5  ;;  %s166_s11 = scalar_lea.vmem (!%p157_p3), [#allocation2], %s421_s9 }
  0x37   : > { %579 = dma.done.wait (%p672_p6), %s163_s10, 1024  }
  0x38   : > { %581 = vsyncadd (%p672_p6), %s163_s10, 4294966272  ;;  %v188_v0 = vld [vmem:[%s166_s11] sm:$0xff]  ;;  %v189_v1 = vld [vmem:[%s166_s11 + $0x8] sm:$0xff]  ;;  %v605_v15 = vmov 0.0|0.0   ;;  %vm606_vm0 = vmmov 0   ;;  %v607_v19 = vmov 0.0   ;;  %v222_v20 = vlaneseq }
  0x39   : > { %v192_v2 = vld [vmem:[%s166_s11 + $0x20] sm:$0xff]  ;;  %v196_v3 = vadd.f32 %v189_v1, %v188_v0  ;;  %v193_v4 = vld [vmem:[%s166_s11 + $0x28] sm:$0xff]  ;;  %v190_v5 = vld [vmem:[%s166_s11 + $0x10] sm:$0xff]  ;;  %443 = vmatprep.subr.bf16.mxu0 %v605_v15  ;;  %440 = vmatprep.mubr.msk.f32.mxu0 %vm606_vm0, %v607_v19  ;;  %vm233_vm1 = vcmask 130112   ;;  %vm240_vm2 = vcmask 195712   ;;  %vm247_vm3 = vcmask 261312  }
  0x3a   : > { %v191_v6 = vld [vmem:[%s166_s11 + $0x18] sm:$0xff]  ;;  %v202_v7 = vadd.f32 %v193_v4, %v192_v2  ;;  %v194_v8 = vld [vmem:[%s166_s11 + $0x30] sm:$0xff]  ;;  %v213_v12 = vld [vmem:[%s809_s1] sm:$0xff]  ;;  %v223_v21 = vand.u32 127, %v222_v20  ;;  %v225_v22 = vshrl.u32 %v222_v20, 7  ;;  %vm249_vm4 = vcmask 261120  }
  0x3b   : > { %v195_v9 = vld [vmem:[%s166_s11 + $0x38] sm:$0xff]  ;;  %197 = vadd.xlane.f32.xlu0 %v196_v3  ;;  %v199_v10 = vadd.f32 %v191_v6, %v190_v5  ;;  %v214_v13 = vld [vmem:[%s809_s1 + $0x8] sm:$0xff]  ;;  %v215_v16 = vld [vmem:[%s809_s1 + $0x10] sm:$0xff]  ;;  %vm322_vm5 = vcmask 32768   ;;  %s423_s27 = sshll.u32 %s650_s16, 4  ;;  %s187_s28 = scalar_lea.vmem [#allocation5], %s733_s5 }
  0x3c   : > { %203 = vadd.xlane.f32.xlu1 %v202_v7  ;;  %v205_v11 = vadd.f32 %v195_v9, %v194_v8  ;;  %v444_v14 = vpack.c.bf16 %v214_v13, %v213_v12  ;;  %v216_v17 = vld [vmem:[%s809_s1 + $0x18] sm:$0xff]  ;;  %v228_v23 = vadd.s32 4294967288, %v223_v21  ;;  %v235_v25 = vadd.s32 4294967280, %v223_v21  ;;  %v217_v45 = vld [vmem:[%s810_s2] sm:$0x1]  ;;  %s348_s29 = sshll.u32 %s187_s28, 4  ;;  %s763_s10 = scalar_lea.hbm %s811_s3, %s423_s27  ;;  %s765_s29 = int_to_ptr.vmem [resolvable:$true] %s348_s29 }
  0x3d   : > { %v447_v18 = vpack.c.bf16 %v216_v17, %v215_v16  ;;  %v242_v26 = vadd.s32 4294967272, %v223_v21  ;;  %v226_v28 = vsub.s32 %v223_v21, %v225_v22  ;;  %s336_s11 = scalar_lea.sflag [#allocation4], %s733_s5  ;;  %s534_s4 = scalar_lea.vmem %s765_s29, 16 }
  0x3e   : > { %445 = vmatpush3.bf16.msra.mxu0 %v444_v14  ;;  %v231_v30 = vsub.s32 %v228_v23, %v225_v22  ;;  %v238_v31 = vsub.s32 %v235_v25, %v225_v22  ;;  %p535_p6 = scmp.ne.s32.totalorder %s765_s29, %s534_s4  ;;  %p818_p11 = scmp.ne.s32.totalorder %s815_s24, 0 }
  0x3f   : > { %200 = vadd.xlane.f32.xlu0 %v199_v10  ;;  %446 = vmatprep.subr.bf16.mxu0 %v605_v15  ;;  %v245_v34 = vsub.s32 %v242_v26, %v225_v22  ;;  %s608_s16 = smov [#allocation5]  }
  0x40   : > { %206 = vadd.xlane.f32.xlu1 %v205_v11  ;;  %p536_p12 = pnand %p535_p6, %p818_p11  ;;  %s538_s6 = sshll.u32 %s608_s16, 4  ;;  %s539_s6 = int_to_ptr.vmem [resolvable:$false] %s538_s6 }
  0x41   : > { %s540_s23 = scalar_lea.vmem %s539_s6, 32  ;;  %p541_p8 = scmp.lt.s32.totalorder %s765_s29, %s539_s6 }
  0x42   : > { %448 = vmatpush3.bf16.msra.mxu0 %v447_v18  ;;  %p537_p13 = pneg %p536_p12  ;;  %p542_p10 = scmp.lt.s32.totalorder %s540_s23, %s534_s4 }
  0x44   : > { %p543_p0 = por %p542_p10, %p541_p8 }
  0x46   : > { %p544_p2 = pnand %p543_p0, %p537_p13 }
  0xc8   : > { %v198_v24 = vpop.xlane.xlu0 %197 }
  0xc9   : > { %v204_v27 = vpop.xlane.xlu1 %203  ;;  %v209_v29 = vmul.f32 0.00390625, %v198_v24 }
  0xca   : > { %v211_v32 = vmul.f32 0.00390625, %v204_v27 }
  0xcb   : > { %v227_v38 = vrot.slane %v209_v29, %v226_v28 }
  0xcc   : > { %v201_v33 = vpop.xlane.xlu0 %200  ;;  %v239_v40 = vrot.slane %v211_v32, %v238_v31 }
  0xcd   : > { %v210_v35 = vmul.f32 0.00390625, %v201_v33  ;;  %v207_v36 = vpop.xlane.xlu1 %206 }
  0xce   : > { %v212_v37 = vmul.f32 0.00390625, %v207_v36 }
  0xcf   : > { %v232_v39 = vrot.slane %v210_v35, %v231_v30 }
  0xd0   : > { %v246_v41 = vrot.slane %v212_v37, %v245_v34 }
  0xd1   : > { %v234_v42 = vsel %vm233_vm1, %v232_v39, %v227_v38 }
  0xd2   : > { %v241_v43 = vsel %vm240_vm2, %v239_v40, %v234_v42 }
  0xd3   : > { %v248_v44 = vsel %vm247_vm3, %v246_v41, %v241_v43 }
  0xd4   : > { %441 = vmatmul.mubr.msk.f32.vlgmr.msra.gmra.mrb[0].mxu0 %vm249_vm4, %v248_v44 }
 0x1a7   : > { %v318_v46 = vpop.f32.mrb[0].mxu0 }
 0x1a8   : > { %v319_v47 = vadd.f32 %v318_v46, %v217_v45  ;;  %v442_v48 = vpop.f32.mrb[1].mxu0 }
 0x1aa   : > { %v323_v49 = vsel %vm322_vm5, %v319_v47, -inf }
 0x1ab   : > { %324 = vmax.xlane.f32.xlu0 %v323_v49 }
 0x238   : > { %v325_v50 = vpop.xlane.xlu0 %324 }
 0x239   : > { %v326_v51 = vsub.f32 %v319_v47, %v325_v50 }
 0x23b   : > { %v327_v52 = vmul.f32 1.442695, %v326_v51 }
 0x23d   : > { %500 = vpow2.f32 %v327_v52 }
 0x247   : > { %v501_v53 = vpop.eup %500 }
 0x248   : > { %v329_v54 = vsel %vm322_vm5, %v501_v53, 0.0 }
 0x249   : > { %330 = vadd.xlane.f32.xlu1 %v329_v54 }
 0x2d6   : > { %v331_v55 = vpop.xlane.xlu1 %330 }
 0x2d7   : > { %502 = vrcp.f32 %v331_v55 }
 0x2e1   : > { %v503_v56 = vpop.eup %502 }
 0x2e2   : > { %v333_v57 = vmul.f32 %v503_v56, %v501_v53 }
 0x2e4   : > { %334 = vst.msk [vmem:[%s187_s28] sm:$0x1] %vm322_vm5, %v333_v57 }
 0x2e5   : > { %547 = shalt.err (!%p544_p2)
}
 0x2e6   : > { %s548_s5 = scalar_lea.hbm %s763_s10, 16  ;;  %s552_s17 = scalar_lea.hbm %s811_s3, 32 }
 0x2e7   : > { %p549_p4 = scmp.ne.s32.totalorder %s763_s10, %s548_s5  ;;  %p553_p9 = scmp.lt.u32.totalorder %s763_s10, %s811_s3 }
 0x2e8   : > { %p554_p1 = scmp.lt.u32.totalorder %s552_s17, %s548_s5  ;;  %p556_p6 = scmp.lt.u32.totalorder %s548_s5, %s763_s10 }
 0x2e9   : > { %p550_p5 = pnand %p549_p4, %p818_p11 }
 0x2ea   : > { %p555_p3 = por %p554_p1, %p553_p9 }
 0x2eb   : > { %p551_p7 = pneg %p550_p5 }
 0x2ec   : > { %p557_p12 = por %p556_p6, %p555_p3 }
 0x2ee   : > { %p558_p13 = pnand %p557_p12, %p551_p7 }
 0x2f0   : > { %561 = shalt.err (!%p558_p13)
}
 0x2f1   : > { %451 = dma.vmem_to_hbm [thread:$0]  (%p818_p11), %s765_s29, 16, %s763_s10, %s336_s11  }
 0x2f2 PF: > { %s360_s22 = sand.u32 1, %s588_s12   ;;  %p819_p8 = scmp.ne.s32.totalorder %s816_s25, 0 }
 0x2f3   : > { %p820_p10 = scmp.ge.s32.totalorder %s600_s15, 2  ;;  %s361_s26 = scalar_lea.sflag [#allocation4], %s360_s22 }
 0x2f5   : > { %p458_p0 = pnand %p820_p10, %p819_p8 }
 0x2f7   : > { %583 = dma.done.wait (!%p458_p0), %s361_s26, 16  }
 0x2f8   : > { %585 = vsyncadd (!%p458_p0), %s361_s26, 4294967280  ;;  %p16_p2 = scmp.ge.s32.totalorder %s654_s18, 4   ;;  %s821_s12 = smov %s592_s13 }
 0x2f9   : > { %s822_s13 = smov %s596_s14  ;;  %s823_s14 = smov %s666_s21 }
 0x2fa   : > { %s824_s15 = smov %s654_s18  ;;  %18 = sbr.rel (!%p16_p2) target bundleno = 5 (0x5), region = 77 }
 0x301   :  { %365 = vsyncpa [#allocation3], 1 }
 0x302   :  { %367 = vsyncpa [#allocation3 + $0x1], 1 }
 0x303   :  { %368 = vsyncpa [#allocation4], 1 }
 0x304   :  { %370 = vsyncpa [#allocation4 + $0x1], 1 }

</bundles_post_ra>
